<compile_context>
chip_gen: v5e
topology: v5e:2x2
jax: 0.10.0
libtpu: 0.0.40
codegen_flags: <defaults>
</compile_context>

<pallas_src>
import functools

import jax
import jax.numpy as jnp
from jax.experimental import pallas as pl
from jax.experimental.pallas import tpu as pltpu

OUT_FEATURES = 50
NUM_CLASSES = 3
LANE = 128          # folded-weight lane padding (MXU-friendly, VMEM-resident)
MAX_TB = 2048       # max batch-tile rows (multiple of 8; ~6 MiB double-buffered)
MIN_GRID_STEPS = 4  # keep >=4 steps when possible (v7x: 2 TCs share the grid)


def _round_up(x, m):
    return (x + m - 1) // m * m


def sentiment_kernel(ht_ref, asp_ref, wh_ref, wa_ref, b_ref, out_ref):
    # acc[tb, 128] = aspect @ Wa_fold + ht @ Wh_fold   (f32 accumulation)
    acc = jnp.dot(asp_ref[...], wa_ref[...], preferred_element_type=jnp.float32)
    acc = acc + jnp.dot(ht_ref[...], wh_ref[...],
                        preferred_element_type=jnp.float32)
    # Store only the 3 real class columns (HBM output is not lane-padded).
    out_ref[...] = (acc[:, :NUM_CLASSES] + b_ref[...]).astype(out_ref.dtype)


def fold_params(params):
    """One-time param prep (call once, outside the hot path).

    Folds the two affine layers into a single affine map. Weights are padded
    to 128 lanes (cheap, VMEM-resident); the bias stays at NUM_CLASSES.
    """
    ws_t = params["ws"].T                    # [100, 3]
    ws_c = ws_t[:OUT_FEATURES]               # [50, 3]  (acts on c)
    ws_h = ws_t[OUT_FEATURES:]               # [50, 3]  (acts on h)

    wa = params["wc"].T @ ws_c               # [aspect_size, 3]
    wh = params["wh"].T @ ws_h               # [hidden_size, 3]
    b0 = params["bc"] @ ws_c + params["bh"] @ ws_h + params["bs"]   # [3]

    def pad_lanes(x2d):
        return jnp.pad(x2d, ((0, 0), (0, LANE - x2d.shape[1])))

    return dict(
        wa=pad_lanes(wa.astype(jnp.float32)),                         # [A, 128]
        wh=pad_lanes(wh.astype(jnp.float32)),                         # [H, 128]
        b=b0.reshape(1, NUM_CLASSES).astype(jnp.float32),             # [1, 3]
    )


@functools.partial(jax.jit, static_argnames=("tb",))
def sentiment_detector(ht, aspect, folded, tb=None):
    """ht: [B, hidden_size], aspect: [B, aspect_size] -> logits [B, 3]."""
    B, hidden = ht.shape
    aspect_size = aspect.shape[1]

    if tb is None:
        # Aim for >= MIN_GRID_STEPS grid steps (v7x megacore), cap at MAX_TB.
        rows_per_step = -(-B // MIN_GRID_STEPS)            # cdiv
        tb = max(8, min(MAX_TB, _round_up(rows_per_step, 8)))
    if tb >= B:
        tb = B  # single full-array block: always a legal BlockSpec

    grid = (pl.cdiv(B, tb),)   # ragged last block: OOB reads unused, writes dropped

    bytes_per_row = (ht.dtype.itemsize * hidden
                     + aspect.dtype.itemsize * aspect_size
                     + 4 * NUM_CLASSES)
    cost = pl.CostEstimate(
        flops=2 * B * (hidden + aspect_size) * NUM_CLASSES,
        transcendentals=0,
        bytes_accessed=B * bytes_per_row + 4 * LANE * (hidden + aspect_size),
    )

    out = pl.pallas_call(
        sentiment_kernel,
        out_shape=jax.ShapeDtypeStruct((B, NUM_CLASSES), jnp.float32),
        grid=grid,
        in_specs=[
            # batch-tiled activations (double-buffered by the pipeline)
            pl.BlockSpec((tb, hidden), lambda i: (i, 0),
                         memory_space=pltpu.VMEM),
            pl.BlockSpec((tb, aspect_size), lambda i: (i, 0),
                         memory_space=pltpu.VMEM),
            # folded weights / bias: same block every step -> VMEM-resident
            pl.BlockSpec((hidden, LANE), lambda i: (0, 0),
                         memory_space=pltpu.VMEM),
            pl.BlockSpec((aspect_size, LANE), lambda i: (0, 0),
                         memory_space=pltpu.VMEM),
            pl.BlockSpec((1, NUM_CLASSES), lambda i: (0, 0),
                         memory_space=pltpu.VMEM),
        ],
        out_specs=pl.BlockSpec((tb, NUM_CLASSES), lambda i: (i, 0),
                               memory_space=pltpu.VMEM),
        compiler_params=pltpu.CompilerParams(
            dimension_semantics=("parallel",)),
        cost_estimate=cost,
    )(ht, aspect, folded["wh"], folded["wa"], folded["b"])

    return out


def init_params(key, hidden_size, aspect_size):
    ks = jax.random.split(key, 6)
    # PyTorch nn.Linear layout: weight [out, in], bias [out].
    def lin(kw, kb, fan_in, fan_out):
        bound = 1.0 / jnp.sqrt(fan_in)
        w = jax.random.uniform(kw, (fan_out, fan_in), jnp.float32, -bound, bound)
        b = jax.random.uniform(kb, (fan_out,), jnp.float32, -bound, bound)
        return w, b
    wc, bc = lin(ks[0], ks[1], aspect_size, OUT_FEATURES)
    wh, bh = lin(ks[2], ks[3], hidden_size, OUT_FEATURES)
    ws, bs = lin(ks[4], ks[5], 2 * OUT_FEATURES, NUM_CLASSES)
    return dict(wc=wc, bc=bc, wh=wh, bh=bh, ws=ws, bs=bs)


if __name__ == "__main__":
    batch, hidden_size, aspect_size = 2, 32, 8

    key = jax.random.PRNGKey(0)
    k_ht, k_asp, k_par = jax.random.split(key, 3)
    ht = jax.random.normal(k_ht, (batch, hidden_size), jnp.float32)
    aspect = jax.random.normal(k_asp, (batch, aspect_size), jnp.float32)
    params = init_params(k_par, hidden_size, aspect_size)

    # One-time weight prep (hoisted out of the call path).
    folded = fold_params(params)

    out = sentiment_detector(ht, aspect, folded)
    out = jax.block_until_ready(out)

    # Pure-JAX reference (same math as the PyTorch forward, un-folded).
    c = aspect @ params["wc"].T + params["bc"]
    h = ht @ params["wh"].T + params["bh"]
    ref = jnp.concatenate([c, h], axis=1) @ params["ws"].T + params["bs"]

    assert out.shape == (batch, NUM_CLASSES)
    # Weight folding reorders f32 accumulation -> ~1e-6..1e-5 level differences.
    assert jnp.allclose(out, ref, atol=1e-4, rtol=1e-4)

    print("KERNEL_OK")
</pallas_src>

<mosaic_0001>
module attributes {stable_mosaic.version = 11 : i64} {
  func.func @sentiment_kernel(%arg0: i32, %arg1: memref<2x32xf32, #tpu.memory_space<vmem>>, %arg2: memref<2x8xf32, #tpu.memory_space<vmem>>, %arg3: memref<32x128xf32, #tpu.memory_space<vmem>>, %arg4: memref<8x128xf32, #tpu.memory_space<vmem>>, %arg5: memref<1x3xf32, #tpu.memory_space<vmem>>, %arg6: memref<2x3xf32, #tpu.memory_space<vmem>>) attributes {dimension_semantics = [#tpu.dimension_semantics<parallel>], iteration_bounds = array<i64: 1>, scalar_prefetch = 0 : i64, scratch_operands = 0 : i64, tpu.core_type = #tpu.core_type<tc>, window_params = [{transform_indices = @transform_0, window_bounds = array<i64: 2, 32>}, {transform_indices = @transform_1, window_bounds = array<i64: 2, 8>}, {pipeline_mode = #tpu.pipeline_mode<synchronous>, transform_indices = @transform_2, window_bounds = array<i64: 32, 128>}, {pipeline_mode = #tpu.pipeline_mode<synchronous>, transform_indices = @transform_3, window_bounds = array<i64: 8, 128>}, {pipeline_mode = #tpu.pipeline_mode<synchronous>, transform_indices = @transform_4, window_bounds = array<i64: 1, 3>}, {transform_indices = @transform_5, window_bounds = array<i64: 2, 3>}]} {
    %c0 = arith.constant 0 : index
    %c0_0 = arith.constant 0 : index
    %0 = vector.load %arg2[%c0, %c0_0] : memref<2x8xf32, #tpu.memory_space<vmem>>, vector<2x8xf32>
    %c0_1 = arith.constant 0 : index
    %c0_2 = arith.constant 0 : index
    %1 = vector.load %arg4[%c0_1, %c0_2] : memref<8x128xf32, #tpu.memory_space<vmem>>, vector<8x128xf32>
    %cst = arith.constant dense<0.000000e+00> : vector<2x128xf32>
    %2 = tpu.matmul %0, %1, %cst {dimension_numbers = #tpu.dot_dimension_numbers<[1], [0], [0], [1], [0, 0, 1, 1], [], []>} : vector<2x8xf32>, vector<8x128xf32>, vector<2x128xf32> -> vector<2x128xf32>
    %c0_3 = arith.constant 0 : index
    %c0_4 = arith.constant 0 : index
    %3 = vector.load %arg1[%c0_3, %c0_4] : memref<2x32xf32, #tpu.memory_space<vmem>>, vector<2x32xf32>
    %c0_5 = arith.constant 0 : index
    %c0_6 = arith.constant 0 : index
    %4 = vector.load %arg3[%c0_5, %c0_6] : memref<32x128xf32, #tpu.memory_space<vmem>>, vector<32x128xf32>
    %cst_7 = arith.constant dense<0.000000e+00> : vector<2x128xf32>
    %5 = tpu.matmul %3, %4, %cst_7 {dimension_numbers = #tpu.dot_dimension_numbers<[1], [0], [0], [1], [0, 0, 1, 1], [], []>} : vector<2x32xf32>, vector<32x128xf32>, vector<2x128xf32> -> vector<2x128xf32>
    %6 = arith.addf %2, %5 : vector<2x128xf32>
    %7 = vector.extract_strided_slice %6 {offsets = [0, 0], sizes = [2, 3], strides = [1, 1]} : vector<2x128xf32> to vector<2x3xf32>
    %c0_8 = arith.constant 0 : index
    %c0_9 = arith.constant 0 : index
    %8 = vector.load %arg5[%c0_8, %c0_9] : memref<1x3xf32, #tpu.memory_space<vmem>>, vector<1x3xf32>
    %9 = vector.broadcast %8 : vector<1x3xf32> to vector<2x3xf32>
    %10 = arith.addf %7, %9 : vector<2x3xf32>
    %c0_10 = arith.constant 0 : index
    %c0_11 = arith.constant 0 : index
    %11 = vector.load %arg6[%c0_10, %c0_11] : memref<2x3xf32, #tpu.memory_space<vmem>>, vector<2x3xf32>
    tpu.vector_store %arg6[%c0_10, %c0_11], %10 {strides = array<i32>} : memref<2x3xf32, #tpu.memory_space<vmem>>, vector<2x3xf32>,
    return
  }
  func.func @transform_0(%arg0: i32) -> (i32, i32) {
    %c0_i32 = arith.constant 0 : i32
    %c0_i32_0 = arith.constant 0 : i32
    return %arg0, %c0_i32 : i32, i32
  }
  func.func @transform_1(%arg0: i32) -> (i32, i32) {
    %c0_i32 = arith.constant 0 : i32
    %c0_i32_0 = arith.constant 0 : i32
    return %arg0, %c0_i32 : i32, i32
  }
  func.func @transform_2(%arg0: i32) -> (i32, i32) {
    %c0_i32 = arith.constant 0 : i32
    %c0_i32_0 = arith.constant 0 : i32
    %c0_i32_1 = arith.constant 0 : i32
    return %c0_i32, %c0_i32_0 : i32, i32
  }
  func.func @transform_3(%arg0: i32) -> (i32, i32) {
    %c0_i32 = arith.constant 0 : i32
    %c0_i32_0 = arith.constant 0 : i32
    %c0_i32_1 = arith.constant 0 : i32
    return %c0_i32, %c0_i32_0 : i32, i32
  }
  func.func @transform_4(%arg0: i32) -> (i32, i32) {
    %c0_i32 = arith.constant 0 : i32
    %c0_i32_0 = arith.constant 0 : i32
    %c0_i32_1 = arith.constant 0 : i32
    return %c0_i32, %c0_i32_0 : i32, i32
  }
  func.func @transform_5(%arg0: i32) -> (i32, i32) {
    %c0_i32 = arith.constant 0 : i32
    %c0_i32_0 = arith.constant 0 : i32
    return %arg0, %c0_i32 : i32, i32
  }
}

</mosaic_0001>

<bundles_post_ra>
// kernel: sentiment_detector.1
= control target key start
LH: loop header
LB: loop body
LE: loop exit
PB: predicated region body
PF: predicated region fallthrough
CT: control target
= control target key end

     0   :  { %10 = vsyncpa [#allocation3], 0  ;;  %s352_s0 = inlined_call_operand.hbm [shape: f32[2,32], index: 0, kind: input, shape index: {}]   ;;  %s353_s1 = inlined_call_operand.hbm [shape: f32[2,8], index: 1, kind: input, shape index: {}]   ;;  %s354_s2 = inlined_call_operand.hbm [shape: f32[32,128], index: 2, kind: input, shape index: {}]   ;;  %s355_s3 = inlined_call_operand.hbm [shape: f32[8,128], index: 3, kind: input, shape index: {}]   ;;  %s356_s4 = inlined_call_operand.vmem [shape: f32[1,3], index: 4, kind: input, shape index: {}]   ;;  %s357_s5 = inlined_call_operand.hbm [shape: f32[2,3], index: 5, kind: output, shape index: {}]  }
   0x1   :  { %11 = vsyncpa [#allocation6], 0 }
   0x2   :  { %12 = vsyncpa [#allocation9], 0  ;;  %s30_s20 = sshll.u32 %s353_s1, 4  ;;  %s31_s20 = int_to_ptr.hbm [resolvable:$true] %s30_s20 }
   0x3   :  { %13 = vsyncpa [#allocation4], 0  ;;  %s297_s21 = smov [#allocation5]   ;;  %s19_s25 = sshll.u32 %s352_s0, 4  ;;  %s20_s25 = int_to_ptr.hbm [resolvable:$true] %s19_s25 }
   0x4   :  { %s32_s22 = sshll.u32 %s297_s21, 4  ;;  %s298_s26 = smov [#allocation2]   ;;  %s33_s22 = int_to_ptr.vmem [resolvable:$true] %s32_s22 }
   0x5   :  { %35 = dma.hbm_to_vmem [thread:$0]  %s31_s20, 32, %s33_s22, [#allocation6]  }
   0x6   :  { %s21_s27 = sshll.u32 %s298_s26, 4  ;;  %s40_s30 = sshll.u32 %s354_s2, 4  ;;  %s22_s27 = int_to_ptr.vmem [resolvable:$true] %s21_s27  ;;  %s41_s30 = int_to_ptr.hbm [resolvable:$true] %s40_s30 }
   0x7   :  { %24 = dma.hbm_to_vmem [thread:$0]  %s20_s25, 32, %s22_s27, [#allocation3]  }
   0x8   :  { %s299_s1 = smov [#allocation7]   ;;  %s54_s9 = sshll.u32 %s355_s3, 4  ;;  %s55_s9 = int_to_ptr.hbm [resolvable:$true] %s54_s9 }
   0x9   :  { %s42_s6 = sshll.u32 %s299_s1, 4  ;;  %s300_s10 = smov 128   ;;  %s43_s6 = int_to_ptr.vmem [resolvable:$true] %s42_s6 }
   0xa   :  { %s301_s0 = smov 8   ;;  %s302_s11 = smov [#allocation8]  }
   0xb   :  { %48 = dma.hbm_to_vmem [thread:$0]  %s41_s30, 512, %s43_s6, [#allocation6], %s300_s10, %s300_s10, %s301_s0  }
   0xc   :  { %s56_s12 = sshll.u32 %s302_s11, 4  ;;  %s57_s12 = int_to_ptr.vmem [resolvable:$true] %s56_s12 }
   0xd   :  { %59 = dma.hbm_to_vmem [thread:$0]  %s55_s9, 128, %s57_s12, [#allocation9]  }
   0xe   :  { %289 = dma.done.wait [#allocation3], 32  }
   0xf   :  { %290 = vsyncadd [#allocation3], 4294967264 }
  0x10   :  { %291 = dma.done.wait [#allocation6], 544  }
  0x11   :  { %292 = vsyncadd [#allocation6], 4294966752 }
  0x12   :  { %293 = dma.done.wait [#allocation9], 128  }
  0x13   :  { %294 = vsyncadd [#allocation9], 4294967168  ;;  %v84_v0 = vld [vmem:[#allocation7 + $0x18] sm:$0xff]  ;;  %v83_v1 = vld [vmem:[#allocation7 + $0x10] sm:$0xff]  ;;  %vm109_vm0 = vcmask 64512   ;;  %vm85_vm1 = vcmask 261120  }
  0x14   :  { %101 = vmatpush.msra.mxu0 %v84_v0  ;;  %v79_v2 = vld [vmem:[#allocation8] sm:$0xff]  ;;  %v82_v3 = vld [vmem:[#allocation7 + $0x8] sm:$0xff]  ;;  %v78_v4 = vld [vmem:[#allocation5] sm:$0x3]  ;;  %s303_s13 = smov [#allocation10]   ;;  %s147_s17 = sshll.u32 %s357_s5, 4  ;;  %s148_s17 = int_to_ptr.hbm [resolvable:$true] %s147_s17 }
  0x15   :  { %128 = vmatpush.msra.mxu1 %v79_v2  ;;  %v81_v5 = vld [vmem:[#allocation7] sm:$0xff]  ;;  %v80_v6 = vld [vmem:[#allocation2] sm:$0x3]  ;;  %s145_s14 = sshll.u32 %s303_s13, 4  ;;  %vm138_vm2 = vcmask 17408   ;;  %s146_s14 = int_to_ptr.vmem [resolvable:$true] %s145_s14 }
  0x16   :  { %102 = vmatpush.msra.mxu0 %v83_v1  ;;  %160 = vmatmul.msk.f32.vlgmr.msra.gmra.mxu1 %vm109_vm0, %v78_v4  ;;  %v168_v8 = vld [vmem:[%s356_s4] ss:$0 sm:$0xff] }
  0x18   :  { %103 = vmatpush.msra.mxu0 %v82_v3 }
  0x1a   :  { %104 = vmatpush.msra.mxu0 %v81_v5 }
  0x1b   :  { %159 = vmatmul.msk.f32.vlgmr.msra.gmra.mxu0 %vm85_vm1, %v80_v6 }
  0x93   :  { %v130_v7 = vpop.f32.mrf.mxu1 }
  0x98   :  { %v106_v9 = vpop.f32.mrf.mxu0 }
  0x99   :  { %v131_v10 = vadd.f32 %v130_v7, %v106_v9 }
  0x9b   :  { %v137_v11 = vadd.f32 %v168_v8, %v131_v10 }
  0x9d   :  { %139 = vst.msk [vmem:[#allocation10] sm:$0x3] %vm138_vm2, %v137_v11 }
  0x9e   :  { %150 = dma.vmem_to_hbm [thread:$0]  %s146_s14, 32, %s148_s17, [#allocation4]  }
  0x9f   :  { %295 = dma.done.wait [#allocation4], 32  }
  0xa0   :  { %296 = vsyncadd [#allocation4], 4294967264 }
  0xa1   :  { %155 = vsyncpa [#allocation3], 1 }
  0xa2   :  { %156 = vsyncpa [#allocation6], 1 }
  0xa3   :  { %157 = vsyncpa [#allocation9], 1 }
  0xa4   :  { %158 = vsyncpa [#allocation4], 1 }

</bundles_post_ra>
